<compile_context>
chip_gen: v7x
topology: tpu7x:2x2x1
jax: 0.10.0
libtpu: 0.0.40
codegen_flags: <defaults>
</compile_context>

<pallas_src>
import functools

import jax
import jax.numpy as jnp
from jax.experimental import pallas as pl
from jax.experimental.pallas import tpu as pltpu


# ---------------------------------------------------------------------------
# Kernels
# ---------------------------------------------------------------------------
def _gcr_small_kernel(x_ref, w_ref, b_ref, o_ref):
    """Single-block path: whole problem resident in VMEM (no grid)."""
    pooled = jnp.sum(x_ref[...].astype(jnp.float32), axis=-1)          # (N, C_in)
    # 1x1 conv on a 1x1 map == dense matmul + bias on the MXU; weight already
    # carries the 1/(H*W) scale.
    y = jnp.dot(pooled, w_ref[...], preferred_element_type=jnp.float32)
    o_ref[...] = (y + b_ref[...]).astype(o_ref.dtype)


def _gcr_grid_kernel(x_ref, w_ref, o_ref, acc_ref, *,
                     t_hw, acc_w, hw, kv_per_split, needs_mask):
    """Gridded path.  grid = (splits, N_tiles, HW_tiles_per_split).

    Hot loop: per-lane partial sums into a (tn, C_in, acc_w) f32 accumulator
    using only VPU adds.  The single XLU lane-reduce + MXU matmul happen only
    at k == last.  Partial outputs (no bias) go to block (s, i); the wrapper
    sums over splits and adds bias.
    """
    k = pl.program_id(2)

    @pl.when(k == 0)
    def _():
        acc_ref[...] = jnp.zeros_like(acc_ref)

    xb = x_ref[...].astype(jnp.float32)                                # (tn, C_in, t_hw)

    if needs_mask:
        # Ragged last HW tile: zero out-of-range lanes so they don't pollute
        # the spatial sum.
        s = pl.program_id(0)
        hw_off = (s * kv_per_split + k) * t_hw
        lane = jax.lax.broadcasted_iota(jnp.int32, (1, 1, t_hw), 2) + hw_off
        xb = jnp.where(lane < hw, xb, 0.0)

    # Per-lane partial sums (pure VPU; no cross-lane work in the hot loop).
    partial = xb[:, :, 0:acc_w]
    for g in range(1, t_hw // acc_w):
        partial = partial + xb[:, :, g * acc_w:(g + 1) * acc_w]
    acc_ref[...] += partial

    @pl.when(k == pl.num_programs(2) - 1)
    def _():
        pooled = jnp.sum(acc_ref[...], axis=-1)                        # one XLU reduce
        y = jnp.dot(pooled, w_ref[...], preferred_element_type=jnp.float32)
        o_ref[...] = y[None].astype(o_ref.dtype)                       # (1, tn, C_out)


# ---------------------------------------------------------------------------
# Wrapper
# ---------------------------------------------------------------------------
_SMALL_X_BYTES = 2 * 1024 * 1024          # below this: single-block, no-grid path
_X_BLOCK_BUDGET_BYTES = 8 * 1024 * 1024   # per-buffer x block for the gridded path
_VMEM_LIMIT_BYTES = 48 * 1024 * 1024      # 2x8 MiB x-bufs + scratch, fits v7x's 64 MiB


def net_gcr_simple_forward(x_nchw, weight_oc_ic, bias_o, *,
                           out_dtype=jnp.float32,
                           force_grid=False,
                           block_n=None,
                           block_hw=None):
    """x_nchw: (N, C_in, H, W) any float dtype; weight: (C_out, C_in); bias: (C_out,)."""
    n, c_in, h, w = x_nchw.shape
    c_out = weight_oc_ic.shape[0]
    hw = h * w

    # Keep x in its native dtype; it dominates HBM traffic.
    x3 = x_nchw.reshape(n, c_in, hw)
    # Fold 1/(H*W) into the tiny transposed weight.
    w_t = jnp.transpose(weight_oc_ic).astype(jnp.float32) / float(hw)  # (C_in, C_out)
    b_f32 = bias_o.astype(jnp.float32)

    x_bytes = x3.size * x3.dtype.itemsize
    cost = pl.CostEstimate(
        flops=n * c_in * hw + 2 * n * c_in * c_out,
        transcendentals=0,
        bytes_accessed=x_bytes + w_t.size * 4 + n * c_out * 4,
    )

    if x_bytes <= _SMALL_X_BYTES and not force_grid:
        # Launch-overhead-bound regime: one whole-array block, no grid.
        # TODO(synk): at these sizes this pool+matmul epilogue is best fused into
        # the kernel producing x; kept standalone to match the module boundary.
        return pl.pallas_call(
            _gcr_small_kernel,
            out_shape=jax.ShapeDtypeStruct((n, c_out), out_dtype),
            in_specs=[
                pl.BlockSpec(memory_space=pltpu.MemorySpace.VMEM),
                pl.BlockSpec(memory_space=pltpu.MemorySpace.VMEM),
                pl.BlockSpec(memory_space=pltpu.MemorySpace.VMEM),
            ],
            out_specs=pl.BlockSpec(memory_space=pltpu.MemorySpace.VMEM),
            cost_estimate=cost,
        )(x3, w_t, b_f32.reshape(1, c_out))

    # ---- gridded, double-buffered reduction over H*W -----------------------
    elem = x3.dtype.itemsize

    # Batch tile: <=8 rows/tile; cdiv grid handles N % 8 != 0 (garbage rows in
    # the ragged batch tile are row-independent and their writes are masked).
    if block_n is not None:
        assert block_n == n or block_n % 8 == 0, "block_n must equal N or be a multiple of 8"
        tn = block_n
    else:
        tn = n if n < 8 else 8
    grid_n = pl.cdiv(n, tn)

    # HW tile: largest multiple of 128 within the per-buffer budget; ragged
    # last tile is lane-masked in the kernel.
    if hw < 128:
        t_hw = hw                                      # full dim (always legal)
    else:
        cap = max(128, (_X_BLOCK_BUDGET_BYTES // (tn * c_in * elem)) // 128 * 128)
        t_hw = min(cap, (hw // 128) * 128)
    if block_hw is not None:
        assert block_hw % 128 == 0 and block_hw <= hw, \
            "block_hw must be a multiple of 128 and <= H*W"
        t_hw = block_hw
    acc_w = min(128, t_hw)
    kt = pl.cdiv(hw, t_hw)
    needs_mask = (kt * t_hw != hw)

    # v7x megacore: if the batch axis gives only one tile, split the reduction
    # into two "parallel" halves so both TensorCores get work.
    splits = 2 if (grid_n == 1 and kt >= 2 and kt % 2 == 0) else 1
    kv_per_split = kt // splits

    kernel = functools.partial(
        _gcr_grid_kernel, t_hw=t_hw, acc_w=acc_w, hw=hw,
        kv_per_split=kv_per_split, needs_mask=needs_mask)

    parts = pl.pallas_call(
        kernel,
        out_shape=jax.ShapeDtypeStruct((splits, n, c_out), jnp.float32),
        grid_spec=pltpu.PrefetchScalarGridSpec(
            num_scalar_prefetch=0,
            grid=(splits, grid_n, kv_per_split),
            in_specs=[
                pl.BlockSpec((tn, c_in, t_hw),
                             lambda s, i, k, kvs=kv_per_split: (i, 0, s * kvs + k)),
                pl.BlockSpec((c_in, c_out), lambda s, i, k: (0, 0)),
            ],
            out_specs=pl.BlockSpec((1, tn, c_out), lambda s, i, k: (s, i, 0)),
            scratch_shapes=[pltpu.VMEM((tn, c_in, acc_w), jnp.float32)],
        ),
        compiler_params=pltpu.CompilerParams(
            dimension_semantics=("parallel", "parallel", "arbitrary"),
            vmem_limit_bytes=_VMEM_LIMIT_BYTES),
        cost_estimate=cost,
    )(x3, w_t)

    y = jnp.sum(parts, axis=0) + b_f32[None, :]
    return y.astype(out_dtype)


# ---------------------------------------------------------------------------
# Self-test
# ---------------------------------------------------------------------------
if __name__ == "__main__":
    key = jax.random.PRNGKey(0)
    kx, kw, kb, kx2, kx3 = jax.random.split(key, 5)

    # Module defaults: in_channels=256, out_channels=12. Small batch/spatial.
    N, C_IN, C_OUT, H, W = 2, 256, 12, 16, 16

    x = jax.random.normal(kx, (N, C_IN, H, W), dtype=jnp.float32)
    bound = 1.0 / (C_IN ** 0.5)
    conv1_weight = jax.random.uniform(kw, (C_OUT, C_IN), jnp.float32, -bound, bound)
    conv1_bias = jax.random.uniform(kb, (C_OUT,), jnp.float32, -bound, bound)

    def torch_ref(xx):
        pooled = jnp.mean(xx.astype(jnp.float32), axis=(2, 3))
        return pooled @ conv1_weight.T + conv1_bias

    # --- 1) small / no-grid path (f32 input) ---
    out = jax.block_until_ready(net_gcr_simple_forward(x, conv1_weight, conv1_bias))
    ref = torch_ref(x)
    assert out.shape == (N, C_OUT)
    assert jnp.allclose(out, ref, atol=1e-4, rtol=1e-4), \
        float(jnp.max(jnp.abs(out - ref)))

    # --- 2) gridded path: bf16 input, ragged (masked) HW tiles + 2-way split ---
    H2 = W2 = 20                                       # hw = 400, not 128-divisible
    x2 = jax.random.normal(kx2, (2, C_IN, H2, W2), jnp.float32).astype(jnp.bfloat16)
    out2 = jax.block_until_ready(
        net_gcr_simple_forward(x2, conv1_weight, conv1_bias,
                               force_grid=True, block_hw=128))
    ref2 = torch_ref(x2)
    assert out2.shape == (2, C_OUT)
    assert jnp.allclose(out2, ref2, atol=2e-3, rtol=2e-3), \
        float(jnp.max(jnp.abs(out2 - ref2)))

    # --- 3) gridded path: N not divisible by the batch tile (ragged batch) ---
    N3 = 10
    x3 = jax.random.normal(kx3, (N3, C_IN, H, W), dtype=jnp.float32)
    out3 = jax.block_until_ready(
        net_gcr_simple_forward(x3, conv1_weight, conv1_bias, force_grid=True))
    ref3 = torch_ref(x3)
    assert out3.shape == (N3, C_OUT)
    assert jnp.allclose(out3, ref3, atol=1e-4, rtol=1e-4), \
        float(jnp.max(jnp.abs(out3 - ref3)))

    print("KERNEL_OK")
</pallas_src>

<mosaic_0001>
module attributes {stable_mosaic.version = 11 : i64} {
  func.func @_gcr_small_kernel(%arg0: memref<2x256x256xf32, #tpu.memory_space<vmem>>, %arg1: memref<256x12xf32, #tpu.memory_space<vmem>>, %arg2: memref<1x12xf32, #tpu.memory_space<vmem>>, %arg3: memref<2x12xf32, #tpu.memory_space<vmem>>) attributes {dimension_semantics = [], scalar_prefetch = 0 : i64, scratch_operands = 0 : i64, tpu.core_type = #tpu.core_type<tc>} {
    %c0 = arith.constant 0 : index
    %c0_0 = arith.constant 0 : index
    %c0_1 = arith.constant 0 : index
    %0 = vector.load %arg0[%c0, %c0_0, %c0_1] : memref<2x256x256xf32, #tpu.memory_space<vmem>>, vector<2x256x256xf32>
    %cst = arith.constant dense<0.000000e+00> : vector<2x256xf32>
    %1 = vector.multi_reduction <add>, %0, %cst [2] : vector<2x256x256xf32> to vector<2x256xf32>
    %c0_2 = arith.constant 0 : index
    %c0_3 = arith.constant 0 : index
    %2 = vector.load %arg1[%c0_2, %c0_3] : memref<256x12xf32, #tpu.memory_space<vmem>>, vector<256x12xf32>
    %cst_4 = arith.constant dense<0.000000e+00> : vector<2x12xf32>
    %3 = tpu.matmul %1, %2, %cst_4 {dimension_numbers = #tpu.dot_dimension_numbers<[1], [0], [0], [1], [0, 0, 1, 1], [], []>} : vector<2x256xf32>, vector<256x12xf32>, vector<2x12xf32> -> vector<2x12xf32>
    %c0_5 = arith.constant 0 : index
    %c0_6 = arith.constant 0 : index
    %4 = vector.load %arg2[%c0_5, %c0_6] : memref<1x12xf32, #tpu.memory_space<vmem>>, vector<1x12xf32>
    %5 = vector.broadcast %4 : vector<1x12xf32> to vector<2x12xf32>
    %6 = arith.addf %3, %5 : vector<2x12xf32>
    %c0_7 = arith.constant 0 : index
    %c0_8 = arith.constant 0 : index
    %7 = vector.load %arg3[%c0_7, %c0_8] : memref<2x12xf32, #tpu.memory_space<vmem>>, vector<2x12xf32>
    tpu.vector_store %arg3[%c0_7, %c0_8], %6 {strides = array<i32>} : memref<2x12xf32, #tpu.memory_space<vmem>>, vector<2x12xf32>,
    return
  }
}

</mosaic_0001>

<bundles_post_ra>
// kernel: tpu_custom_call.1
= control target key start
LH: loop header
LB: loop body
LE: loop exit
PB: predicated region body
PF: predicated region fallthrough
CT: control target
= control target key end

     0   :  { %8 = vsyncpa [#allocation3], 0  ;;  %s1407_s0 = inlined_call_operand.hbm [shape: f32[2,256,256], index: 0, kind: input, shape index: {}]   ;;  %s1408_s1 = inlined_call_operand.vmem [shape: f32[256,12], index: 1, kind: input, shape index: {}]   ;;  %s1409_s2 = inlined_call_operand.vmem [shape: f32[1,12], index: 2, kind: input, shape index: {}]   ;;  %s1410_s3 = inlined_call_operand.hbm [shape: f32[2,12], index: 3, kind: output, shape index: {}]  }
   0x1   :  { %9 = vsyncpa [#allocation4], 0  ;;  %s1012_s12 = smov [#allocation2]   ;;  %s964_s16 = scalar_lea.hbm %s1407_s0, 16384 }
   0x2   :  { %s15_s13 = sshll.u32 %s1012_s12, 4  ;;  %p965_p0 = scmp.ne.s32.totalorder %s1407_s0, %s964_s16  ;;  %s16_s13 = int_to_ptr.vmem [resolvable:$true] %s15_s13 }
   0x3   :  { %p968_p1 = scmp.lt.u32.totalorder %s964_s16, %s1407_s0 }
   0x5   :  { %p970_p2 = pnand %p968_p1, %p965_p0 }
   0x7   :  { %973 = shalt.err (!%p970_p2)
}
   0x8   :  { %s974_s21 = scalar_lea.vmem %s16_s13, 16384  ;;  %p979_p4 = scmp.lt.s32.totalorder %s16_s13, %s16_s13 }
   0x9   :  { %p975_p3 = scmp.ne.s32.totalorder %s16_s13, %s974_s21  ;;  %p980_p5 = scmp.lt.s32.totalorder %s974_s21, %s974_s21 }
   0xb   :  { %p981_p6 = por %p980_p5, %p979_p4 }
   0xd   :  { %p982_p7 = pnand %p981_p6, %p975_p3 }
   0xf   :  { %985 = shalt.err (!%p982_p7)
}
  0x10   :  { %s1013_s22 = smov 256   ;;  %s1014_s23 = smov 16  }
  0x11   :  { %21 = dma.hbm_to_vmem [thread:$0]  %s1407_s0, 16384, %s16_s13, [#allocation3], %s1013_s22, %s1013_s22, %s1014_s23  }
  0x12   :  { %1008 = dma.done.wait [#allocation3], 16384  }
  0x13   :  { %1009 = vsyncadd [#allocation3], 4294950912  ;;  %v125_v0 = vld [vmem:[#allocation2 + $0x300] sm:$0xff]  ;;  %v126_v1 = vld [vmem:[#allocation2 + $0x308] sm:$0xff]  ;;  %vm463_vm0 = vcmask 130112   ;;  %vm470_vm1 = vcmask 195712  }
  0x14   :  { %v61_v2 = vld [vmem:[#allocation2 + $0x100] sm:$0xff]  ;;  %v301_v3 = vadd.f32 %v126_v1, %v125_v0  ;;  %v62_v4 = vld [vmem:[#allocation2 + $0x108] sm:$0xff]  ;;  %v127_v5 = vld [vmem:[#allocation2 + $0x310] sm:$0xff]  ;;  %vm477_vm2 = vcmask 261312   ;;  %vm484_vm3 = vcmask 326912   ;;  %vm491_vm4 = vcmask 392512  }
  0x15   :  { %v128_v6 = vld [vmem:[#allocation2 + $0x318] sm:$0xff]  ;;  %v205_v7 = vadd.f32 %v62_v4, %v61_v2  ;;  %v63_v8 = vld [vmem:[#allocation2 + $0x110] sm:$0xff]  ;;  %v29_v14 = vld [vmem:[#allocation2] sm:$0xff]  ;;  %vm498_vm5 = vcmask 458112   ;;  %vm505_vm6 = vcmask 523712   ;;  %vm512_vm7 = vcmask 589312  }
  0x16   :  { %v64_v9 = vld [vmem:[#allocation2 + $0x118] sm:$0xff]  ;;  %302 = vadd.xlane.f32.xlu1 %v301_v3  ;;  %v304_v10 = vadd.f32 %v128_v6, %v127_v5  ;;  %v31_v12 = vld [vmem:[#allocation2 + $0x10] sm:$0xff]  ;;  %v30_v15 = vld [vmem:[#allocation2 + $0x8] sm:$0xff]  ;;  %vm519_vm8 = vcmask 654912   ;;  %vm526_vm9 = vcmask 720512   ;;  %vm533_vm10 = vcmask 786112  }
  0x17   :  { %206 = vadd.xlane.f32.xlu0 %v205_v7  ;;  %v208_v11 = vadd.f32 %v64_v9, %v63_v8  ;;  %v32_v13 = vld [vmem:[#allocation2 + $0x18] sm:$0xff]  ;;  %v157_v17 = vadd.f32 %v30_v15, %v29_v14  ;;  %v93_v18 = vld [vmem:[#allocation2 + $0x200] sm:$0xff]  ;;  %v94_v19 = vld [vmem:[#allocation2 + $0x208] sm:$0xff]  ;;  %vm540_vm11 = vcmask 851712   ;;  %vm547_vm12 = vcmask 917312   ;;  %s1015_s7 = smov [#allocation5]  }
  0x18   :  { %v160_v16 = vadd.f32 %v32_v13, %v31_v12  ;;  %v65_v20 = vld [vmem:[#allocation2 + $0x120] sm:$0xff]  ;;  %v66_v21 = vld [vmem:[#allocation2 + $0x128] sm:$0xff]  ;;  %v253_v22 = vadd.f32 %v94_v19, %v93_v18  ;;  %v95_v26 = vld [vmem:[#allocation2 + $0x210] sm:$0xff]  ;;  %vm554_vm13 = vcmask 982912   ;;  %vm561_vm14 = vcmask 1048512   ;;  %s883_s8 = sshll.u32 %s1015_s7, 4  ;;  %s884_s8 = int_to_ptr.vmem [resolvable:$true] %s883_s8 }
  0x19   :  { %v211_v23 = vadd.f32 %v66_v21, %v65_v20  ;;  %v129_v24 = vld [vmem:[#allocation2 + $0x320] sm:$0xff]  ;;  %v130_v25 = vld [vmem:[#allocation2 + $0x328] sm:$0xff]  ;;  %v96_v27 = vld [vmem:[#allocation2 + $0x218] sm:$0xff]  ;;  %vm800_vm15 = vcmask 1041409   ;;  %s986_s9 = scalar_lea.vmem %s884_s8, 32  ;;  %p991_p9 = scmp.lt.s32.totalorder %s884_s8, %s884_s8 }
  0x1a   :  { %305 = vadd.xlane.f32.xlu1 %v304_v10  ;;  %v307_v28 = vadd.f32 %v130_v25, %v129_v24  ;;  %v256_v29 = vadd.f32 %v96_v27, %v95_v26  ;;  %v67_v30 = vld [vmem:[#allocation2 + $0x130] sm:$0xff]  ;;  %v68_v31 = vld [vmem:[#allocation2 + $0x138] sm:$0xff]  ;;  %v33_v32 = vld [vmem:[#allocation2 + $0x20] sm:$0xff]  ;;  %p987_p8 = scmp.ne.s32.totalorder %s884_s8, %s986_s9  ;;  %p992_p10 = scmp.lt.s32.totalorder %s986_s9, %s986_s9 }
  0x1b   :  { %209 = vadd.xlane.f32.xlu0 %v208_v11  ;;  %v34_v33 = vld [vmem:[#allocation2 + $0x28] sm:$0xff]  ;;  %v214_v34 = vadd.f32 %v68_v31, %v67_v30  ;;  %v131_v36 = vld [vmem:[#allocation2 + $0x330] sm:$0xff]  ;;  %v132_v37 = vld [vmem:[#allocation2 + $0x338] sm:$0xff] }
  0x1c   :  { %v163_v35 = vadd.f32 %v34_v33, %v33_v32  ;;  %v97_v38 = vld [vmem:[#allocation2 + $0x220] sm:$0xff]  ;;  %v98_v39 = vld [vmem:[#allocation2 + $0x228] sm:$0xff]  ;;  %v310_v40 = vadd.f32 %v132_v37, %v131_v36  ;;  %v35_v44 = vld [vmem:[#allocation2 + $0x30] sm:$0xff]  ;;  %p993_p11 = por %p992_p10, %p991_p9 }
  0x1d   :  { %v259_v41 = vadd.f32 %v98_v39, %v97_v38  ;;  %v69_v42 = vld [vmem:[#allocation2 + $0x140] sm:$0xff]  ;;  %v70_v43 = vld [vmem:[#allocation2 + $0x148] sm:$0xff]  ;;  %v36_v45 = vld [vmem:[#allocation2 + $0x38] sm:$0xff] }
  0x1e   :  { %161 = vadd.xlane.f32.xlu1 %v160_v16  ;;  %v217_v46 = vadd.f32 %v70_v43, %v69_v42  ;;  %v166_v47 = vadd.f32 %v36_v45, %v35_v44  ;;  %v133_v48 = vld [vmem:[#allocation2 + $0x340] sm:$0xff]  ;;  %v134_v49 = vld [vmem:[#allocation2 + $0x348] sm:$0xff]  ;;  %v99_v50 = vld [vmem:[#allocation2 + $0x230] sm:$0xff]  ;;  %p994_p12 = pnand %p993_p11, %p987_p8 }
  0x1f   :  { %158 = vadd.xlane.f32.xlu0 %v157_v17  ;;  %v100_v51 = vld [vmem:[#allocation2 + $0x238] sm:$0xff]  ;;  %v313_v52 = vadd.f32 %v134_v49, %v133_v48  ;;  %v71_v54 = vld [vmem:[#allocation2 + $0x150] sm:$0xff]  ;;  %v37_v56 = vld [vmem:[#allocation2 + $0x40] sm:$0xff] }
  0x20   :  { %v262_v53 = vadd.f32 %v100_v51, %v99_v50  ;;  %v72_v55 = vld [vmem:[#allocation2 + $0x158] sm:$0xff]  ;;  %v38_v57 = vld [vmem:[#allocation2 + $0x48] sm:$0xff]  ;;  %v135_v60 = vld [vmem:[#allocation2 + $0x350] sm:$0xff] }
  0x21   :  { %v220_v58 = vadd.f32 %v72_v55, %v71_v54  ;;  %v169_v59 = vadd.f32 %v38_v57, %v37_v56  ;;  %v136_v61 = vld [vmem:[#allocation2 + $0x358] sm:$0xff]  ;;  %v101_v62 = vld [vmem:[#allocation2 + $0x240] sm:$0xff]  ;;  %v102_v63 = vld [vmem:[#allocation2 + $0x248] sm:$0xff] }
  0x22   :  { %254 = vadd.xlane.f32.xlu1 %v253_v22  ;;  %v316_v0 = vadd.f32 %v136_v61, %v135_v60  ;;  %v265_v1 = vadd.f32 %v102_v63, %v101_v62  ;;  %v73_v2 = vld [vmem:[#allocation2 + $0x160] sm:$0xff]  ;;  %v74_v3 = vld [vmem:[#allocation2 + $0x168] sm:$0xff]  ;;  %v39_v4 = vld [vmem:[#allocation2 + $0x50] sm:$0xff] }
  0x23   :  { %212 = vadd.xlane.f32.xlu0 %v211_v23  ;;  %v40_v5 = vld [vmem:[#allocation2 + $0x58] sm:$0xff]  ;;  %v223_v6 = vadd.f32 %v74_v3, %v73_v2  ;;  %v137_v8 = vld [vmem:[#allocation2 + $0x360] sm:$0xff]  ;;  %v138_v9 = vld [vmem:[#allocation2 + $0x368] sm:$0xff] }
  0x24   :  { %v172_v7 = vadd.f32 %v40_v5, %v39_v4  ;;  %v103_v10 = vld [vmem:[#allocation2 + $0x250] sm:$0xff]  ;;  %v104_v11 = vld [vmem:[#allocation2 + $0x258] sm:$0xff]  ;;  %v319_v12 = vadd.f32 %v138_v9, %v137_v8  ;;  %v41_v16 = vld [vmem:[#allocation2 + $0x60] sm:$0xff] }
  0x25   :  { %v268_v13 = vadd.f32 %v104_v11, %v103_v10  ;;  %v75_v14 = vld [vmem:[#allocation2 + $0x170] sm:$0xff]  ;;  %v76_v15 = vld [vmem:[#allocation2 + $0x178] sm:$0xff]  ;;  %v42_v17 = vld [vmem:[#allocation2 + $0x68] sm:$0xff] }
  0x26   :  { %308 = vadd.xlane.f32.xlu1 %v307_v28  ;;  %v226_v18 = vadd.f32 %v76_v15, %v75_v14  ;;  %v175_v19 = vadd.f32 %v42_v17, %v41_v16  ;;  %v139_v20 = vld [vmem:[#allocation2 + $0x370] sm:$0xff]  ;;  %v140_v21 = vld [vmem:[#allocation2 + $0x378] sm:$0xff]  ;;  %v105_v22 = vld [vmem:[#allocation2 + $0x260] sm:$0xff] }
  0x27   :  { %257 = vadd.xlane.f32.xlu0 %v256_v29  ;;  %v106_v23 = vld [vmem:[#allocation2 + $0x268] sm:$0xff]  ;;  %v322_v24 = vadd.f32 %v140_v21, %v139_v20  ;;  %v77_v26 = vld [vmem:[#allocation2 + $0x180] sm:$0xff]  ;;  %v43_v28 = vld [vmem:[#allocation2 + $0x70] sm:$0xff] }
  0x28   :  { %v271_v25 = vadd.f32 %v106_v23, %v105_v22  ;;  %v78_v27 = vld [vmem:[#allocation2 + $0x188] sm:$0xff]  ;;  %v44_v29 = vld [vmem:[#allocation2 + $0x78] sm:$0xff]  ;;  %v141_v32 = vld [vmem:[#allocation2 + $0x380] sm:$0xff] }
  0x29   :  { %v229_v30 = vadd.f32 %v78_v27, %v77_v26  ;;  %v178_v31 = vadd.f32 %v44_v29, %v43_v28  ;;  %v142_v33 = vld [vmem:[#allocation2 + $0x388] sm:$0xff]  ;;  %v79_v38 = vld [vmem:[#allocation2 + $0x190] sm:$0xff]  ;;  %v80_v39 = vld [vmem:[#allocation2 + $0x198] sm:$0xff] }
  0x2a   :  { %215 = vadd.xlane.f32.xlu1 %v214_v34  ;;  %v107_v34 = vld [vmem:[#allocation2 + $0x270] sm:$0xff]  ;;  %v325_v36 = vadd.f32 %v142_v33, %v141_v32  ;;  %v232_v42 = vadd.f32 %v80_v39, %v79_v38  ;;  %v144_v45 = vld [vmem:[#allocation2 + $0x398] sm:$0xff]  ;;  %v81_v50 = vld [vmem:[#allocation2 + $0x1a0] sm:$0xff] }
  0x2b   :  { %164 = vadd.xlane.f32.xlu0 %v163_v35  ;;  %v108_v35 = vld [vmem:[#allocation2 + $0x278] sm:$0xff]  ;;  %v143_v44 = vld [vmem:[#allocation2 + $0x390] sm:$0xff]  ;;  %v82_v51 = vld [vmem:[#allocation2 + $0x1a8] sm:$0xff] }
  0x2c   :  { %v274_v37 = vadd.f32 %v108_v35, %v107_v34  ;;  %v328_v48 = vadd.f32 %v144_v45, %v143_v44  ;;  %v235_v54 = vadd.f32 %v82_v51, %v81_v50  ;;  %v145_v56 = vld [vmem:[#allocation2 + $0x3a0] sm:$0xff]  ;;  %v146_v57 = vld [vmem:[#allocation2 + $0x3a8] sm:$0xff]  ;;  %v83_v62 = vld [vmem:[#allocation2 + $0x1b0] sm:$0xff] }
  0x2d   :  { %v331_v60 = vadd.f32 %v146_v57, %v145_v56  ;;  %v84_v63 = vld [vmem:[#allocation2 + $0x1b8] sm:$0xff]  ;;  %v147_v4 = vld [vmem:[#allocation2 + $0x3b0] sm:$0xff]  ;;  %v85_v10 = vld [vmem:[#allocation2 + $0x1c0] sm:$0xff] }
  0x2e   :  { %311 = vadd.xlane.f32.xlu1 %v310_v40  ;;  %v45_v40 = vld [vmem:[#allocation2 + $0x80] sm:$0xff]  ;;  %v238_v2 = vadd.f32 %v84_v63, %v83_v62  ;;  %v148_v5 = vld [vmem:[#allocation2 + $0x3b8] sm:$0xff]  ;;  %v86_v11 = vld [vmem:[#allocation2 + $0x1c8] sm:$0xff] }
  0x2f   :  { %260 = vadd.xlane.f32.xlu0 %v259_v41  ;;  %v46_v41 = vld [vmem:[#allocation2 + $0x88] sm:$0xff]  ;;  %v334_v8 = vadd.f32 %v148_v5, %v147_v4  ;;  %v241_v14 = vadd.f32 %v86_v11, %v85_v10  ;;  %v149_v16 = vld [vmem:[#allocation2 + $0x3c0] sm:$0xff]  ;;  %v87_v22 = vld [vmem:[#allocation2 + $0x1d0] sm:$0xff] }
  0x30   :  { %v181_v43 = vadd.f32 %v46_v41, %v45_v40  ;;  %v150_v17 = vld [vmem:[#allocation2 + $0x3c8] sm:$0xff]  ;;  %v88_v23 = vld [vmem:[#allocation2 + $0x1d8] sm:$0xff]  ;;  %v151_v28 = vld [vmem:[#allocation2 + $0x3d0] sm:$0xff] }
  0x31   :  { %v337_v20 = vadd.f32 %v150_v17, %v149_v16  ;;  %v244_v26 = vadd.f32 %v88_v23, %v87_v22  ;;  %v152_v29 = vld [vmem:[#allocation2 + $0x3d8] sm:$0xff]  ;;  %v89_v34 = vld [vmem:[#allocation2 + $0x1e0] sm:$0xff]  ;;  %v90_v35 = vld [vmem:[#allocation2 + $0x1e8] sm:$0xff] }
  0x32   :  { %218 = vadd.xlane.f32.xlu1 %v217_v46  ;;  %v109_v46 = vld [vmem:[#allocation2 + $0x280] sm:$0xff]  ;;  %v340_v32 = vadd.f32 %v152_v29, %v151_v28  ;;  %v247_v38 = vadd.f32 %v90_v35, %v89_v34  ;;  %v154_v41 = vld [vmem:[#allocation2 + $0x3e8] sm:$0xff]  ;;  %v91_v45 = vld [vmem:[#allocation2 + $0x1f0] sm:$0xff] }
  0x33   :  { %167 = vadd.xlane.f32.xlu0 %v166_v47  ;;  %v110_v47 = vld [vmem:[#allocation2 + $0x288] sm:$0xff]  ;;  %v153_v40 = vld [vmem:[#allocation2 + $0x3e0] sm:$0xff]  ;;  %v155_v57 = vld [vmem:[#allocation2 + $0x3f0] sm:$0xff] }
  0x34   :  { %v277_v49 = vadd.f32 %v110_v47, %v109_v46  ;;  %v343_v44 = vadd.f32 %v154_v41, %v153_v40  ;;  %v365_v46 = vld [vmem:[%s1408_s1 + $0x80] sm:$0xff]  ;;  %v366_v47 = vld [vmem:[%s1408_s1 + $0x88] sm:$0xff]  ;;  %v351_v63 = vld [vmem:[%s1408_s1 + $0x10] sm:$0xff] }
  0x35   :  { %v928_v50 = vpack.c.bf16 %v366_v47, %v365_v46  ;;  %v349_v51 = vld [vmem:[%s1408_s1] sm:$0xff]  ;;  %v123_v5 = vld [vmem:[#allocation2 + $0x2f0] sm:$0xff]  ;;  %v356_v22 = vld [vmem:[%s1408_s1 + $0x38] sm:$0xff] }
  0x36   :  { %314 = vadd.xlane.f32.xlu1 %v313_v52  ;;  %v47_v52 = vld [vmem:[#allocation2 + $0x90] sm:$0xff]  ;;  %v353_v11 = vld [vmem:[%s1408_s1 + $0x20] sm:$0xff]  ;;  %v358_v28 = vld [vmem:[%s1408_s1 + $0x48] sm:$0xff] }
  0x37   :  { %263 = vadd.xlane.f32.xlu0 %v262_v53  ;;  %v48_v53 = vld [vmem:[#allocation2 + $0x98] sm:$0xff]  ;;  %929 = vmatprep.subr.bf16.mxu0 %v928_v50  ;;  %v371_v17 = vld [vmem:[%s1408_s1 + $0xb0] sm:$0xff]  ;;  %v361_v40 = vld [vmem:[%s1408_s1 + $0x60] sm:$0xff] }
  0x38   :  { %v184_v55 = vadd.f32 %v48_v53, %v47_v52  ;;  %v350_v52 = vld [vmem:[%s1408_s1 + $0x8] sm:$0xff]  ;;  %v57_v53 = vld [vmem:[#allocation2 + $0xe0] sm:$0xff]  ;;  %v360_v34 = vld [vmem:[%s1408_s1 + $0x58] sm:$0xff] }
  0x39   :  { %v362_v41 = vld [vmem:[%s1408_s1 + $0x68] sm:$0xff]  ;;  %v363_v47 = vld [vmem:[%s1408_s1 + $0x70] sm:$0xff] }
  0x3a   :  { %221 = vadd.xlane.f32.xlu1 %v220_v58  ;;  %v111_v58 = vld [vmem:[#allocation2 + $0x290] sm:$0xff] }
  0x3b   :  { %170 = vadd.xlane.f32.xlu0 %v169_v59  ;;  %v112_v59 = vld [vmem:[#allocation2 + $0x298] sm:$0xff] }
  0x3c   :  { %v280_v61 = vadd.f32 %v112_v59, %v111_v58  ;;  %v367_v58 = vld [vmem:[%s1408_s1 + $0x90] sm:$0xff]  ;;  %v368_v59 = vld [vmem:[%s1408_s1 + $0x98] sm:$0xff] }
  0x3d   :  { %v932_v62 = vpack.c.bf16 %v368_v59, %v367_v58 }
  0x3e   :  { %317 = vadd.xlane.f32.xlu1 %v316_v0  ;;  %v49_v0 = vld [vmem:[#allocation2 + $0xa0] sm:$0xff] }
  0x3f   :  { %266 = vadd.xlane.f32.xlu0 %v265_v1  ;;  %v50_v1 = vld [vmem:[#allocation2 + $0xa8] sm:$0xff] }
  0x40   :  { %v187_v3 = vadd.f32 %v50_v1, %v49_v0  ;;  %v352_v0 = vld [vmem:[%s1408_s1 + $0x18] sm:$0xff]  ;;  %v121_v1 = vld [vmem:[#allocation2 + $0x2e0] sm:$0xff] }
  0x42   :  { %224 = vadd.xlane.f32.xlu1 %v223_v6  ;;  %v113_v6 = vld [vmem:[#allocation2 + $0x2a0] sm:$0xff] }
  0x43   :  { %173 = vadd.xlane.f32.xlu0 %v172_v7  ;;  %v114_v7 = vld [vmem:[#allocation2 + $0x2a8] sm:$0xff] }
  0x44   :  { %v283_v9 = vadd.f32 %v114_v7, %v113_v6  ;;  %v369_v6 = vld [vmem:[%s1408_s1 + $0xa0] sm:$0xff]  ;;  %v370_v7 = vld [vmem:[%s1408_s1 + $0xa8] sm:$0xff] }
  0x45   :  { %v936_v10 = vpack.c.bf16 %v370_v7, %v369_v6 }
  0x46   :  { %320 = vadd.xlane.f32.xlu1 %v319_v12  ;;  %v51_v12 = vld [vmem:[#allocation2 + $0xb0] sm:$0xff] }
  0x47   :  { %269 = vadd.xlane.f32.xlu0 %v268_v13  ;;  %v52_v13 = vld [vmem:[#allocation2 + $0xb8] sm:$0xff] }
  0x48   :  { %v190_v15 = vadd.f32 %v52_v13, %v51_v12  ;;  %v354_v12 = vld [vmem:[%s1408_s1 + $0x28] sm:$0xff]  ;;  %v59_v13 = vld [vmem:[#allocation2 + $0xf0] sm:$0xff] }
  0x4a   :  { %227 = vadd.xlane.f32.xlu1 %v226_v18  ;;  %v115_v18 = vld [vmem:[#allocation2 + $0x2b0] sm:$0xff] }
  0x4b   :  { %176 = vadd.xlane.f32.xlu0 %v175_v19  ;;  %v116_v19 = vld [vmem:[#allocation2 + $0x2b8] sm:$0xff] }
  0x4c   :  { %v286_v21 = vadd.f32 %v116_v19, %v115_v18  ;;  %v372_v18 = vld [vmem:[%s1408_s1 + $0xb8] sm:$0xff] }
  0x4e   :  { %323 = vadd.xlane.f32.xlu1 %v322_v24  ;;  %v53_v24 = vld [vmem:[#allocation2 + $0xc0] sm:$0xff] }
  0x4f   :  { %272 = vadd.xlane.f32.xlu0 %v271_v25  ;;  %v54_v25 = vld [vmem:[#allocation2 + $0xc8] sm:$0xff] }
  0x50   :  { %v193_v27 = vadd.f32 %v54_v25, %v53_v24  ;;  %v373_v24 = vld [vmem:[%s1408_s1 + $0xc0] sm:$0xff]  ;;  %v374_v25 = vld [vmem:[%s1408_s1 + $0xc8] sm:$0xff] }
  0x52   :  { %230 = vadd.xlane.f32.xlu1 %v229_v30  ;;  %v117_v30 = vld [vmem:[#allocation2 + $0x2c0] sm:$0xff] }
  0x53   :  { %179 = vadd.xlane.f32.xlu0 %v178_v31  ;;  %v118_v31 = vld [vmem:[#allocation2 + $0x2c8] sm:$0xff] }
  0x54   :  { %v289_v33 = vadd.f32 %v118_v31, %v117_v30  ;;  %v375_v30 = vld [vmem:[%s1408_s1 + $0xd0] sm:$0xff]  ;;  %v376_v31 = vld [vmem:[%s1408_s1 + $0xd8] sm:$0xff] }
  0x56   :  { %326 = vadd.xlane.f32.xlu1 %v325_v36  ;;  %v55_v36 = vld [vmem:[#allocation2 + $0xd0] sm:$0xff] }
  0x57   :  { %275 = vadd.xlane.f32.xlu0 %v274_v37  ;;  %v56_v37 = vld [vmem:[#allocation2 + $0xd8] sm:$0xff] }
  0x58   :  { %v196_v39 = vadd.f32 %v56_v37, %v55_v36  ;;  %v452_v36 = vlaneseq  ;;  %v377_v37 = vld [vmem:[%s1408_s1 + $0xe0] sm:$0xff] }
  0x5a   :  { %233 = vadd.xlane.f32.xlu1 %v232_v42  ;;  %v119_v42 = vld [vmem:[#allocation2 + $0x2d0] sm:$0xff] }
  0x5b   :  { %182 = vadd.xlane.f32.xlu0 %v181_v43  ;;  %v120_v43 = vld [vmem:[#allocation2 + $0x2d8] sm:$0xff] }
  0x5e   :  { %329 = vadd.xlane.f32.xlu1 %v328_v48  ;;  %v292_v48 = vadd.f32 %v120_v43, %v119_v42  ;;  %v954_v42 = vpack.c.bf16 %v362_v41, %v361_v40  ;;  %v1132_v43 = vand.u32 127, %v452_v36 }
  0x5f   :  { %278 = vadd.xlane.f32.xlu0 %v277_v49  ;;  %v92_v49 = vld [vmem:[#allocation2 + $0x1f8] sm:$0xff] }
  0x60   :  { %v250_v56 = vadd.f32 %v92_v49, %v91_v45  ;;  %v380_v45 = vld [vmem:[%s1408_s1 + $0xf8] sm:$0xff]  ;;  %v1146_v49 = vshrl.u32 %v452_v36, 7  ;;  %v458_v50 = vadd.s32 4294967288, %v1132_v43 }
  0x62   :  { %236 = vadd.xlane.f32.xlu1 %v235_v54  ;;  %v58_v54 = vld [vmem:[#allocation2 + $0xe8] sm:$0xff] }
  0x63   :  { %185 = vadd.xlane.f32.xlu0 %v184_v55  ;;  %v930_v55 = vpack.c.bf16 %v350_v52, %v349_v51 }
  0x65   :  { %931 = vmatpush3.bf16.msra.mxu0 %v930_v55  ;;  %v461_v55 = vsub.s32 %v458_v50, %v1146_v49 }
  0x66   :  { %332 = vadd.xlane.f32.xlu1 %v331_v60  ;;  %v199_v60 = vadd.f32 %v58_v54, %v57_v53  ;;  %933 = vmatprep.subr.bf16.mxu0 %v932_v62  ;;  %v456_v53 = vsub.s32 %v1132_v43, %v1146_v49  ;;  %v465_v62 = vadd.s32 4294967280, %v1132_v43 }
  0x67   :  { %281 = vadd.xlane.f32.xlu0 %v280_v61  ;;  %v156_v61 = vld [vmem:[#allocation2 + $0x3f8] sm:$0xff] }
  0x68   :  { %v346_v4 = vadd.f32 %v156_v61, %v155_v57 }
  0x6a   :  { %239 = vadd.xlane.f32.xlu1 %v238_v2  ;;  %v122_v2 = vld [vmem:[#allocation2 + $0x2e8] sm:$0xff] }
  0x6b   :  { %188 = vadd.xlane.f32.xlu0 %v187_v3  ;;  %v934_v3 = vpack.c.bf16 %v352_v0, %v351_v63 }
  0x6d   :  { %935 = vmatpush3.bf16.msra.mxu0 %v934_v3 }
  0x6e   :  { %335 = vadd.xlane.f32.xlu1 %v334_v8  ;;  %v295_v8 = vadd.f32 %v122_v2, %v121_v1  ;;  %937 = vmatprep.subr.bf16.mxu0 %v936_v10 }
  0x6f   :  { %284 = vadd.xlane.f32.xlu0 %v283_v9  ;;  %v124_v9 = vld [vmem:[#allocation2 + $0x2f8] sm:$0xff] }
  0x70   :  { %v298_v16 = vadd.f32 %v124_v9, %v123_v5  ;;  %v468_v5 = vsub.s32 %v465_v62, %v1146_v49  ;;  %v472_v9 = vadd.s32 4294967272, %v1132_v43 }
  0x72   :  { %242 = vadd.xlane.f32.xlu1 %v241_v14  ;;  %v60_v14 = vld [vmem:[#allocation2 + $0xf8] sm:$0xff] }
  0x73   :  { %191 = vadd.xlane.f32.xlu0 %v190_v15  ;;  %v938_v15 = vpack.c.bf16 %v354_v12, %v353_v11  ;;  %v202_v19 = vadd.f32 %v60_v14, %v59_v13 }
  0x75   :  { %939 = vmatpush3.bf16.msra.mxu0 %v938_v15  ;;  %v475_v15 = vsub.s32 %v472_v9, %v1146_v49 }
  0x76   :  { %338 = vadd.xlane.f32.xlu1 %v337_v20  ;;  %v940_v20 = vpack.c.bf16 %v372_v18, %v371_v17 }
  0x77   :  { %287 = vadd.xlane.f32.xlu0 %v286_v21  ;;  %v355_v21 = vld [vmem:[%s1408_s1 + $0x30] sm:$0xff] }
  0x78   :  { %v942_v23 = vpack.c.bf16 %v356_v22, %v355_v21  ;;  %941 = vmatprep.subr.bf16.mxu0 %v940_v20 }
  0x7a   :  { %245 = vadd.xlane.f32.xlu1 %v244_v26  ;;  %943 = vmatpush3.bf16.msra.mxu0 %v942_v23  ;;  %v944_v26 = vpack.c.bf16 %v374_v25, %v373_v24  ;;  %v479_v23 = vadd.s32 4294967264, %v1132_v43 }
  0x7b   :  { %194 = vadd.xlane.f32.xlu0 %v193_v27  ;;  %v357_v27 = vld [vmem:[%s1408_s1 + $0x40] sm:$0xff] }
  0x7c   :  { %v946_v29 = vpack.c.bf16 %v358_v28, %v357_v27  ;;  %945 = vmatprep.subr.bf16.mxu0 %v944_v26 }
  0x7e   :  { %341 = vadd.xlane.f32.xlu1 %v340_v32  ;;  %947 = vmatpush3.bf16.msra.mxu0 %v946_v29  ;;  %v948_v32 = vpack.c.bf16 %v376_v31, %v375_v30  ;;  %v482_v30 = vsub.s32 %v479_v23, %v1146_v49 }
  0x7f   :  { %290 = vadd.xlane.f32.xlu0 %v289_v33  ;;  %v359_v33 = vld [vmem:[%s1408_s1 + $0x50] sm:$0xff] }
  0x80   :  { %v950_v35 = vpack.c.bf16 %v360_v34, %v359_v33  ;;  %949 = vmatprep.subr.bf16.mxu0 %v948_v32 }
  0x82   :  { %248 = vadd.xlane.f32.xlu1 %v247_v38  ;;  %951 = vmatpush3.bf16.msra.mxu0 %v950_v35  ;;  %v378_v38 = vld [vmem:[%s1408_s1 + $0xe8] sm:$0xff] }
  0x83   :  { %197 = vadd.xlane.f32.xlu0 %v196_v39  ;;  %v952_v39 = vpack.c.bf16 %v378_v38, %v377_v37  ;;  %v486_v37 = vadd.s32 4294967256, %v1132_v43 }
  0x85   :  { %953 = vmatprep.subr.bf16.mxu0 %v952_v39 }
  0x86   :  { %344 = vadd.xlane.f32.xlu1 %v343_v44  ;;  %955 = vmatpush3.bf16.msra.mxu0 %v954_v42  ;;  %v379_v44 = vld [vmem:[%s1408_s1 + $0xf0] sm:$0xff] }
  0x87   :  { %293 = vadd.xlane.f32.xlu0 %v292_v48  ;;  %v956_v46 = vpack.c.bf16 %v380_v45, %v379_v44  ;;  %v364_v48 = vld [vmem:[%s1408_s1 + $0x78] sm:$0xff]  ;;  %v489_v45 = vsub.s32 %v486_v37, %v1146_v49 }
  0x88   :  { %v958_v51 = vpack.c.bf16 %v364_v48, %v363_v47 }
  0x89   :  { %957 = vmatprep.subr.bf16.mxu0 %v956_v46 }
  0x8a   :  { %251 = vadd.xlane.f32.xlu1 %v250_v56  ;;  %959 = vmatpush3.bf16.msra.mxu0 %v958_v51 }
  0x8b   :  { %200 = vadd.xlane.f32.xlu0 %v199_v60 }
  0x8e   :  { %347 = vadd.xlane.f32.xlu1 %v346_v4 }
  0x8f   :  { %296 = vadd.xlane.f32.xlu0 %v295_v8 }
  0x92   :  { %299 = vadd.xlane.f32.xlu1 %v298_v16 }
  0x93   :  { %203 = vadd.xlane.f32.xlu0 %v202_v19 }
  0xa3   :  { %v303_v52 = vpop.xlane.xlu1 %302 }
  0xa4   :  { %v207_v54 = vpop.xlane.xlu0 %206  ;;  %v724_v57 = vrot.slane %v303_v52, %v456_v53 }
  0xa5   :  { %v566_v60 = vrot.slane %v207_v54, %v456_v53 }
  0xa7   :  { %v306_v56 = vpop.xlane.xlu1 %305 }
  0xa8   :  { %v728_v58 = vrot.slane %v306_v56, %v461_v55  ;;  %v210_v59 = vpop.xlane.xlu0 %209 }
  0xa9   :  { %v570_v61 = vrot.slane %v210_v59, %v461_v55 }
  0xaa   :  { %v729_v63 = vsel %vm463_vm0, %v728_v58, %v724_v57 }
  0xab   :  { %v571_v0 = vsel %vm463_vm0, %v570_v61, %v566_v60  ;;  %v162_v1 = vpop.xlane.xlu1 %161 }
  0xac   :  { %v462_v2 = vrot.slane %v162_v1, %v461_v55  ;;  %v159_v3 = vpop.xlane.xlu0 %158 }
  0xad   :  { %v457_v4 = vrot.slane %v159_v3, %v456_v53 }
  0xaf   :  { %v464_v6 = vsel %vm463_vm0, %v462_v2, %v457_v4  ;;  %v255_v7 = vpop.xlane.xlu1 %254 }
  0xb0   :  { %v213_v8 = vpop.xlane.xlu0 %212  ;;  %v645_v16 = vrot.slane %v255_v7, %v456_v53  ;;  %v493_v53 = vadd.s32 4294967248, %v1132_v43 }
  0xb1   :  { %v575_v10 = vrot.slane %v213_v8, %v468_v5 }
  0xb2   :  { %v1178_v60 = vsub.s32 %v493_v53, %v1146_v49 }
  0xb3   :  { %v576_v11 = vsel %vm470_vm1, %v575_v10, %v571_v0  ;;  %v309_v12 = vpop.xlane.xlu1 %308 }
  0xb4   :  { %v733_v13 = vrot.slane %v309_v12, %v468_v5  ;;  %v258_v14 = vpop.xlane.xlu0 %257 }
  0xb5   :  { %v649_v17 = vrot.slane %v258_v14, %v461_v55 }
  0xb6   :  { %v734_v18 = vsel %vm470_vm1, %v733_v13, %v729_v63 }
  0xb7   :  { %v650_v19 = vsel %vm463_vm0, %v649_v17, %v645_v16  ;;  %v216_v20 = vpop.xlane.xlu1 %215  ;;  %vm875_vm0 = vcmask 91136  }
  0xb8   :  { %v580_v21 = vrot.slane %v216_v20, %v475_v15  ;;  %v165_v22 = vpop.xlane.xlu0 %164 }
  0xb9   :  { %v469_v24 = vrot.slane %v165_v22, %v468_v5 }
  0xba   :  { %v581_v25 = vsel %vm477_vm2, %v580_v21, %v576_v11 }
  0xbb   :  { %v471_v26 = vsel %vm470_vm1, %v469_v24, %v464_v6  ;;  %v312_v27 = vpop.xlane.xlu1 %311 }
  0xbc   :  { %v738_v28 = vrot.slane %v312_v27, %v475_v15  ;;  %v261_v29 = vpop.xlane.xlu0 %260 }
  0xbd   :  { %v654_v31 = vrot.slane %v261_v29, %v468_v5 }
  0xbe   :  { %v739_v32 = vsel %vm477_vm2, %v738_v28, %v734_v18 }
  0xbf   :  { %v655_v33 = vsel %vm470_vm1, %v654_v31, %v650_v19  ;;  %v219_v34 = vpop.xlane.xlu1 %218 }
  0xc0   :  { %v585_v35 = vrot.slane %v219_v34, %v482_v30  ;;  %v168_v36 = vpop.xlane.xlu0 %167 }
  0xc1   :  { %v476_v38 = vrot.slane %v168_v36, %v475_v15  ;;  %v514_v36 = vadd.s32 4294967224, %v1132_v43 }
  0xc2   :  { %v586_v39 = vsel %vm484_vm3, %v585_v35, %v581_v25  ;;  %v507_v35 = vadd.s32 4294967232, %v1132_v43 }
  0xc3   :  { %v478_v40 = vsel %vm477_vm2, %v476_v38, %v471_v26  ;;  %v315_v41 = vpop.xlane.xlu1 %314 }
  0xc4   :  { %v743_v42 = vrot.slane %v315_v41, %v482_v30  ;;  %v264_v44 = vpop.xlane.xlu0 %263  ;;  %v528_v41 = vadd.s32 4294967208, %v1132_v43 }
  0xc5   :  { %v659_v46 = vrot.slane %v264_v44, %v475_v15  ;;  %v535_v44 = vadd.s32 4294967200, %v1132_v43 }
  0xc6   :  { %v744_v47 = vsel %vm484_vm3, %v743_v42, %v739_v32  ;;  %v510_v42 = vsub.s32 %v507_v35, %v1146_v49 }
  0xc7   :  { %v660_v48 = vsel %vm477_vm2, %v659_v46, %v655_v33  ;;  %v222_v50 = vpop.xlane.xlu1 %221  ;;  %v500_v33 = vadd.s32 4294967240, %v1132_v43  ;;  %v1256_v46 = vsub.s32 %v514_v36, %v1146_v49 }
  0xc8   :  { %v590_v51 = vrot.slane %v222_v50, %v489_v45  ;;  %v171_v52 = vpop.xlane.xlu0 %170  ;;  %v556_v50 = vadd.s32 4294967176, %v1132_v43 }
  0xc9   :  { %v483_v54 = vrot.slane %v171_v52, %v482_v30  ;;  %v503_v38 = vsub.s32 %v500_v33, %v1146_v49 }
  0xca   :  { %v591_v55 = vsel %vm491_vm4, %v590_v51, %v586_v39  ;;  %v521_v39 = vadd.s32 4294967216, %v1132_v43 }
  0xcb   :  { %v485_v56 = vsel %vm484_vm3, %v483_v54, %v478_v40  ;;  %v318_v57 = vpop.xlane.xlu1 %317 }
  0xcc   :  { %v748_v58 = vrot.slane %v318_v57, %v489_v45  ;;  %v267_v59 = vpop.xlane.xlu0 %266  ;;  %v1265_v53 = vsub.s32 %v521_v39, %v1146_v49  ;;  %v1273_v57 = vsub.s32 %v528_v41, %v1146_v49 }
  0xcd   :  { %v664_v61 = vrot.slane %v267_v59, %v482_v30 }
  0xce   :  { %v1181_v62 = vsel %vm491_vm4, %v748_v58, %v744_v47  ;;  %v1278_v58 = vsub.s32 %v535_v44, %v1146_v49 }
  0xcf   :  { %v665_v63 = vsel %vm484_vm3, %v664_v61, %v660_v48  ;;  %v225_v0 = vpop.xlane.xlu1 %224  ;;  %v549_v48 = vadd.s32 4294967184, %v1132_v43 }
  0xd0   :  { %v595_v1 = vrot.slane %v225_v0, %v1178_v60  ;;  %v174_v2 = vpop.xlane.xlu0 %173 }
  0xd1   :  { %v490_v3 = vrot.slane %v174_v2, %v489_v45  ;;  %v1286_v0 = vsub.s32 %v549_v48, %v1146_v49  ;;  %v1291_v2 = vsub.s32 %v556_v50, %v1146_v49 }
  0xd2   :  { %v1186_v4 = vsel %vm498_vm5, %v595_v1, %v591_v55 }
  0xd3   :  { %v1189_v5 = vsel %vm491_vm4, %v490_v3, %v485_v56  ;;  %v1191_v6 = vpop.xlane.xlu1 %320 }
  0xd4   :  { %v270_v7 = vpop.xlane.xlu0 %269  ;;  %v753_v51 = vrot.slane %v1191_v6, %v1178_v60 }
  0xd5   :  { %v669_v8 = vrot.slane %v270_v7, %v489_v45  ;;  %v542_v45 = vadd.s32 4294967192, %v1132_v43 }
  0xd7   :  { %v1194_v9 = vsel %vm491_vm4, %v669_v8, %v665_v63  ;;  %v228_v10 = vpop.xlane.xlu1 %227  ;;  %v1281_v59 = vsub.s32 %v542_v45, %v1146_v49 }
  0xd8   :  { %v1196_v11 = vpop.xlane.xlu0 %176  ;;  %v600_v52 = vrot.slane %v228_v10, %v503_v38 }
  0xd9   :  { %v497_v55 = vrot.slane %v1196_v11, %v1178_v60 }
  0xda   :  { %v601_v3 = vsel %vm505_vm6, %v600_v52, %v1186_v4 }
  0xdb   :  { %v1198_v12 = vpop.xlane.xlu1 %323  ;;  %v499_v10 = vsel %vm498_vm5, %v497_v55, %v1189_v5 }
  0xdc   :  { %v1200_v13 = vpop.xlane.xlu0 %272  ;;  %v758_v56 = vrot.slane %v1198_v12, %v503_v38 }
  0xdd   :  { %v674_v43 = vrot.slane %v1200_v13, %v1178_v60  ;;  %v754_v60 = vsel %vm498_vm5, %v753_v51, %v1181_v62 }
  0xde   :  { %v759_v11 = vsel %vm505_vm6, %v758_v56, %v754_v60 }
  0xdf   :  { %v1202_v14 = vpop.xlane.xlu1 %230  ;;  %v675_v4 = vsel %vm498_vm5, %v674_v43, %v1194_v9 }
  0xe0   :  { %v1204_v15 = vpop.xlane.xlu0 %179  ;;  %v605_v61 = vrot.slane %v1202_v14, %v510_v42 }
  0xe1   :  { %v504_v63 = vrot.slane %v1204_v15, %v503_v38 }
  0xe2   :  { %v606_v5 = vsel %vm512_vm7, %v605_v61, %v601_v3 }
  0xe3   :  { %v1206_v16 = vpop.xlane.xlu1 %326  ;;  %v506_v15 = vsel %vm505_vm6, %v504_v63, %v499_v10 }
  0xe4   :  { %v1208_v17 = vpop.xlane.xlu0 %275  ;;  %v763_v6 = vrot.slane %v1206_v16, %v510_v42 }
  0xe5   :  { %v679_v7 = vrot.slane %v1208_v17, %v503_v38 }
  0xe7   :  { %v1210_v18 = vpop.xlane.xlu1 %233 }
  0xe8   :  { %v1212_v19 = vpop.xlane.xlu0 %182  ;;  %v610_v49 = vrot.slane %v1210_v18, %v1256_v46  ;;  %v764_v18 = vsel %vm512_vm7, %v763_v6, %v759_v11 }
  0xe9   :  { %v511_v62 = vrot.slane %v1212_v19, %v510_v42  ;;  %v680_v19 = vsel %vm505_vm6, %v679_v7, %v675_v4 }
  0xea   :  { %v611_v33 = vsel %vm519_vm8, %v610_v49, %v606_v5 }
  0xeb   :  { %v1214_v20 = vpop.xlane.xlu1 %329 }
  0xec   :  { %v1216_v21 = vpop.xlane.xlu0 %278  ;;  %v768_v12 = vrot.slane %v1214_v20, %v1256_v46 }
  0xed   :  { %v684_v13 = vrot.slane %v1216_v21, %v510_v42 }
  0xee   :  { %v769_v36 = vsel %vm519_vm8, %v768_v12, %v764_v18 }
  0xef   :  { %v1218_v22 = vpop.xlane.xlu1 %236  ;;  %v685_v38 = vsel %vm512_vm7, %v684_v13, %v680_v19 }
  0xf0   :  { %v1220_v23 = vpop.xlane.xlu0 %185  ;;  %v615_v14 = vrot.slane %v1218_v22, %v1265_v53 }
  0xf1   :  { %v518_v16 = vrot.slane %v1220_v23, %v1256_v46  ;;  %v513_v23 = vsel %vm512_vm7, %v511_v62, %v506_v15 }
  0xf3   :  { %v1222_v24 = vpop.xlane.xlu1 %332  ;;  %v520_v39 = vsel %vm519_vm8, %v518_v16, %v513_v23 }
  0xf4   :  { %v1224_v25 = vpop.xlane.xlu0 %281  ;;  %v773_v17 = vrot.slane %v1222_v24, %v1265_v53 }
  0xf5   :  { %v689_v20 = vrot.slane %v1224_v25, %v1256_v46  ;;  %v616_v25 = vsel %vm526_vm9, %v615_v14, %v611_v33 }
  0xf6   :  { %v774_v41 = vsel %vm526_vm9, %v773_v17, %v769_v36 }
  0xf7   :  { %v1226_v26 = vpop.xlane.xlu1 %239  ;;  %v690_v44 = vsel %vm519_vm8, %v689_v20, %v685_v38  ;;  %v892_v20 = vld [vmem:[%s1409_s2] ss:$0 sm:$0xff] }
  0xf8   :  { %v1228_v27 = vpop.xlane.xlu0 %188  ;;  %v620_v21 = vrot.slane %v1226_v26, %v1273_v57 }
  0xf9   :  { %v525_v24 = vrot.slane %v1228_v27, %v1265_v53 }
  0xfa   :  { %v621_v45 = vsel %vm533_vm10, %v620_v21, %v616_v25 }
  0xfb   :  { %v1230_v28 = vpop.xlane.xlu1 %335  ;;  %v527_v50 = vsel %vm526_vm9, %v525_v24, %v520_v39 }
  0xfc   :  { %v1232_v29 = vpop.xlane.xlu0 %284  ;;  %v778_v35 = vrot.slane %v1230_v28, %v1273_v57 }
  0xfd   :  { %v694_v26 = vrot.slane %v1232_v29, %v1265_v53 }
  0xfe   :  { %v779_v51 = vsel %vm533_vm10, %v778_v35, %v774_v41 }
  0xff   :  { %v1234_v30 = vpop.xlane.xlu1 %242  ;;  %v695_v52 = vsel %vm526_vm9, %v694_v26, %v690_v44 }
 0x100   :  { %v1236_v31 = vpop.xlane.xlu0 %191  ;;  %v625_v42 = vrot.slane %v1234_v30, %v1278_v58 }
 0x101   :  { %v532_v53 = vrot.slane %v1236_v31, %v1273_v57 }
 0x102   :  { %v626_v55 = vsel %vm540_vm11, %v625_v42, %v621_v45 }
 0x103   :  { %v1238_v32 = vpop.xlane.xlu1 %338  ;;  %v534_v49 = vsel %vm533_vm10, %v532_v53, %v527_v50 }
 0x104   :  { %v1241_v34 = vpop.xlane.xlu0 %287  ;;  %v783_v27 = vrot.slane %v1238_v32, %v1278_v58 }
 0x106   :  { %v784_v56 = vsel %vm540_vm11, %v783_v27, %v779_v51 }
 0x107   :  { %v1245_v37 = vpop.xlane.xlu1 %245 }
 0x108   :  { %v1249_v40 = vpop.xlane.xlu0 %194  ;;  %v630_v46 = vrot.slane %v1245_v37, %v1281_v59  ;;  %v699_v37 = vrot.slane %v1241_v34, %v1273_v57 }
 0x109   :  { %v539_v43 = vrot.slane %v1249_v40, %v1278_v58 }
 0x10b   :  { %v1258_v47 = vpop.xlane.xlu1 %341 }
 0x10c   :  { %v1267_v54 = vpop.xlane.xlu0 %290  ;;  %v788_v29 = vrot.slane %v1258_v47, %v1281_v59 }
 0x10d   :  { %v704_v61 = vrot.slane %v1267_v54, %v1278_v58  ;;  %v700_v54 = vsel %vm533_vm10, %v699_v37, %v695_v52 }
 0x10e   :  { %v789_v31 = vsel %vm547_vm12, %v788_v29, %v784_v56 }
 0x10f   :  { %v1288_v1 = vpop.xlane.xlu1 %248  ;;  %v705_v62 = vsel %vm540_vm11, %v704_v61, %v700_v54 }
 0x110   :  { %v1299_v8 = vpop.xlane.xlu0 %197  ;;  %v635_v30 = vrot.slane %v1288_v1, %v1286_v0  ;;  %v631_v1 = vsel %vm547_vm12, %v630_v46, %v626_v55 }
 0x111   :  { %v546_v3 = vrot.slane %v1299_v8, %v1281_v59  ;;  %v541_v8 = vsel %vm540_vm11, %v539_v43, %v534_v49 }
 0x112   :  { %v636_v40 = vsel %vm554_vm13, %v635_v30, %v631_v1 }
 0x113   :  { %v345_v9 = vpop.xlane.xlu1 %344 }
 0x114   :  { %v294_v22 = vpop.xlane.xlu0 %293  ;;  %v793_v32 = vrot.slane %v345_v9, %v1286_v0 }
 0x115   :  { %v709_v60 = vrot.slane %v294_v22, %v1281_v59 }
 0x116   :  { %v794_v7 = vsel %vm554_vm13, %v793_v32, %v789_v31 }
 0x117   :  { %v252_v28 = vpop.xlane.xlu1 %251  ;;  %v710_v12 = vsel %vm547_vm12, %v709_v60, %v705_v62 }
 0x118   :  { %v201_v48 = vpop.xlane.xlu0 %200  ;;  %v640_v47 = vrot.slane %v252_v28, %v1291_v2 }
 0x119   :  { %v553_v58 = vrot.slane %v201_v48, %v1286_v0 }
 0x11a   :  { %v641_v10 = vsel %vm561_vm14, %v640_v47, %v636_v40 }
 0x11b   :  { %v348_v63 = vpop.xlane.xlu1 %347 }
 0x11c   :  { %v798_v34 = vrot.slane %v348_v63, %v1291_v2  ;;  %v297_v57 = vpop.xlane.xlu0 %296 }
 0x11d   :  { %v714_v6 = vrot.slane %v297_v57, %v1286_v0  ;;  %v548_v0 = vsel %vm547_vm12, %v546_v3, %v541_v8 }
 0x11e   :  { %v799_v11 = vsel %vm561_vm14, %v798_v34, %v794_v7  ;;  %v555_v16 = vsel %vm554_vm13, %v553_v58, %v548_v0 }
 0x11f   :  { %v300_v4 = vpop.xlane.xlu1 %299  ;;  %v802_v59 = vsel %vm800_vm15, %v799_v11, %v641_v10  ;;  %v715_v5 = vsel %vm554_vm13, %v714_v6, %v710_v12 }
 0x120   :  { %v719_v13 = vrot.slane %v300_v4, %v1291_v2  ;;  %v204_v14 = vpop.xlane.xlu0 %203  ;;  %869 = vmatprep.mubr.f32.mxu0 %v802_v59 }
 0x121   :  { %v560_v15 = vrot.slane %v204_v14, %v1291_v2 }
 0x122   :  { %v720_v17 = vsel %vm561_vm14, %v719_v13, %v715_v5 }
 0x123   :  { %v562_v9 = vsel %vm561_vm14, %v560_v15, %v555_v16 }
 0x124   :  { %v801_v18 = vsel %vm800_vm15, %v720_v17, %v562_v9 }
 0x125   :  { %870 = vmatmul.mubr.f32.vlgmr.msra.gmra.mrb[0].mxu0 %v801_v18 }
 0x1f8   :  { %v925_v19 = vpop.f32.mrb[0].mxu0 }
 0x1f9   :  { %v926_v21 = vpop.f32.mrb[1].mxu0 }
 0x1fa   :  { %v927_v22 = vadd.f32 %v926_v21, %v925_v19 }
 0x1fc   :  { %v872_v2 = vadd.f32 %v927_v22, %v892_v20 }
 0x1fe   :  { %876 = vst.msk [vmem:[#allocation5] sm:$0x3] %vm875_vm0, %v872_v2 }
 0x1ff   :  { %997 = shalt.err (!%p994_p12)
}
 0x200   :  { %s998_s12 = scalar_lea.hbm %s1410_s3, 32 }
 0x201   :  { %p999_p13 = scmp.ne.s32.totalorder %s1410_s3, %s998_s12  ;;  %p1002_p0 = scmp.lt.u32.totalorder %s998_s12, %s1410_s3 }
 0x203   :  { %p1004_p1 = pnand %p1002_p0, %p999_p13 }
 0x205   :  { %1007 = shalt.err (!%p1004_p1)
}
 0x206   :  { %886 = dma.vmem_to_hbm [thread:$0]  %s884_s8, 32, %s1410_s3, [#allocation4]  }
 0x207   :  { %1010 = dma.done.wait [#allocation4], 32  }
 0x208   :  { %1011 = vsyncadd [#allocation4], 4294967264 }
 0x209   :  { %890 = vsyncpa [#allocation3], 1 }
 0x20a   :  { %891 = vsyncpa [#allocation4], 1 }

</bundles_post_ra>
